<compile_context>
chip_gen: v5e
topology: v5e:2x2
jax: 0.10.0
libtpu: 0.0.40
codegen_flags: <defaults>
</compile_context>

<pallas_src>
import functools

import jax
import jax.numpy as jnp
from jax.experimental import pallas as pl
from jax.experimental.pallas import tpu as pltpu

_LANE = 128  # TPU vreg lane width


def _round_up(x, m):
    return ((x + m - 1) // m) * m


def _device_kind():
    try:
        return jax.devices()[0].device_kind.lower()
    except Exception:
        return ""


def _max_tile_rows(itemsize, kind):
    """Max sublane rows per (1, TR, 128) block, sized per TPU generation."""
    if "v7" in kind:
        block_bytes = 4 << 20   # 4 MiB/block -> ~16 MiB double-buffered in+out (of 32 MiB scoped)
    elif "v6" in kind:
        block_bytes = 2 << 20   # 2 MiB/block -> ~8 MiB VMEM
    else:
        block_bytes = 1 << 20   # v5e / unknown: 1 MiB/block -> ~4 MiB VMEM (16 MiB scoped default)
    return max(8, block_bytes // (_LANE * itemsize))


def _plan_tiling(rows, max_tile, channels):
    """Returns (tile_rows, num_tiles, rows_padded) minimizing padding."""
    num_tiles = pl.cdiv(rows, max_tile)
    if num_tiles == 1:
        # Full-extent block: exempt from the 8-sublane divisibility rule.
        tile_rows = rows
        # Dual-TC (v7x) load balance: make C*num_tiles even when it costs no padding.
        if channels % 2 == 1 and rows % 16 == 0:
            num_tiles, tile_rows = 2, rows // 2
    else:
        # Balanced tiles: padding capped at < 8 rows per tile.
        tile_rows = _round_up(pl.cdiv(rows, num_tiles), 8)
    return tile_rows, num_tiles, num_tiles * tile_rows


def _make_kernel(compute_dtype):
    def kernel(shift_ref, img_ref, out_ref):
        # shift_ref: (C,) f32 table in SMEM; img_ref/out_ref: (1, TR, 128) VMEM tile.
        s = shift_ref[pl.program_id(0)].astype(compute_dtype)
        x = img_ref[...].astype(compute_dtype) + s
        out_ref[...] = jnp.clip(x, 0, 1).astype(out_ref.dtype)
    return kernel


@functools.partial(jax.jit, static_argnames=("min_shift", "max_shift"))
def random_channel_shift(img, key, min_shift=-0.1, max_shift=0.1):
    """Applies a random per-channel shift and clamps the result to [0, 1]."""
    if not jnp.issubdtype(img.dtype, jnp.floating):
        raise TypeError(
            f"random_channel_shift expects a floating-point image, got {img.dtype}")
    C, H, W = img.shape

    # One uniform shift per channel, like `(max-min)*torch.rand(1)+min` per loop iter.
    shifts = (max_shift - min_shift) * jax.random.uniform(
        key, (C,), dtype=jnp.float32) + min_shift

    kind = _device_kind()
    itemsize = jnp.dtype(img.dtype).itemsize
    # v5e has no bf16 VALU: upcast 16-bit inputs to f32 there; native dtype elsewhere.
    compute_dtype = jnp.float32 if (itemsize < 4 and "v5" in kind) else img.dtype

    # --- Lane-dense re-layout: (C, H, W) -> (C, rows_p, 128) ----------------
    L = H * W
    rows = pl.cdiv(L, _LANE)
    tile_rows, num_tiles, rows_p = _plan_tiling(rows, _max_tile_rows(itemsize, kind), C)
    padded = rows_p * _LANE

    flat = img.reshape(C, L)
    if padded != L:
        # Slow path only when H*W is not lane/tile friendly.
        flat = jnp.pad(flat, ((0, 0), (0, padded - L)))
    flat = flat.reshape(C, rows_p, _LANE)

    out_flat = pl.pallas_call(
        _make_kernel(compute_dtype),
        out_shape=jax.ShapeDtypeStruct((C, rows_p, _LANE), img.dtype),
        grid=(C, num_tiles),
        in_specs=[
            # Per-channel shift table: tiny, kept whole in SMEM.
            pl.BlockSpec(memory_space=pltpu.MemorySpace.SMEM),
            # One lane-dense row-tile of one channel per grid step.
            pl.BlockSpec((1, tile_rows, _LANE), lambda c, t: (c, t, 0)),
        ],
        out_specs=pl.BlockSpec((1, tile_rows, _LANE), lambda c, t: (c, t, 0)),
        # Write the result back into `flat`'s buffer (saves one C*H*W HBM alloc).
        input_output_aliases={1: 0},
        cost_estimate=pl.CostEstimate(
            flops=3 * C * rows_p * _LANE,
            transcendentals=0,
            bytes_accessed=2 * C * rows_p * _LANE * itemsize),
        compiler_params=pltpu.CompilerParams(
            # Every (channel, row-tile) block is independent.
            dimension_semantics=("parallel", "parallel")),
    )(shifts, flat)

    out = out_flat.reshape(C, padded)
    if padded != L:
        out = out[:, :L]
    return out.reshape(C, H, W)


def random_channel_shift_ref(img, key, min_shift=-0.1, max_shift=0.1):
    """Pure-JAX reference for correctness checking."""
    C = img.shape[0]
    shifts = (max_shift - min_shift) * jax.random.uniform(
        key, (C,), dtype=jnp.float32) + min_shift
    return jnp.clip(img + shifts[:, None, None].astype(img.dtype), 0.0, 1.0)


if __name__ == "__main__":
    key = jax.random.PRNGKey(0)
    k_img, k_shift, k_img2, k_shift2 = jax.random.split(key, 4)

    # Fast path: H*W % 128 == 0 -> pure reshape, no padding, no output slice.
    C, H, W = 4, 16, 16
    img = jax.random.uniform(k_img, (C, H, W), dtype=jnp.float32)
    out = jax.block_until_ready(random_channel_shift(img, k_shift))
    ref = random_channel_shift_ref(img, k_shift)
    assert out.shape == (C, H, W)
    assert jnp.allclose(out, ref, atol=1e-6), "fast-path mismatch vs reference"
    assert float(out.max()) <= 1.0 and float(out.min()) >= 0.0

    # Padded path: awkward spatial size + odd channel count.
    C2, H2, W2 = 3, 7, 9
    img2 = jax.random.uniform(k_img2, (C2, H2, W2), dtype=jnp.float32)
    out2 = jax.block_until_ready(random_channel_shift(img2, k_shift2))
    ref2 = random_channel_shift_ref(img2, k_shift2)
    assert out2.shape == (C2, H2, W2)
    assert jnp.allclose(out2, ref2, atol=1e-6), "padded-path mismatch vs reference"
    assert float(out2.max()) <= 1.0 and float(out2.min()) >= 0.0

    print("KERNEL_OK")
</pallas_src>

<mosaic_0001>
module attributes {stable_mosaic.version = 11 : i64} {
  func.func @kernel(%arg0: i32, %arg1: i32, %arg2: memref<4xf32, #tpu.memory_space<smem>>, %arg3: memref<1x2x128xf32, #tpu.memory_space<vmem>>, %arg4: memref<1x2x128xf32, #tpu.memory_space<vmem>>) attributes {dimension_semantics = [#tpu.dimension_semantics<parallel>, #tpu.dimension_semantics<parallel>], iteration_bounds = array<i64: 4, 1>, scalar_prefetch = 0 : i64, scratch_operands = 0 : i64, tpu.core_type = #tpu.core_type<tc>, window_params = [{transform_indices = @transform_0, window_bounds = array<i64: 4>}, {transform_indices = @transform_1, window_bounds = array<i64: 1, 2, 128>}, {transform_indices = @transform_2, window_bounds = array<i64: 1, 2, 128>}]} {
    %0 = arith.index_cast %arg0 : i32 to index
    %1 = memref.load %arg2[%0] : memref<4xf32, #tpu.memory_space<smem>>
    %c0 = arith.constant 0 : index
    %c0_0 = arith.constant 0 : index
    %c0_1 = arith.constant 0 : index
    %2 = vector.load %arg3[%c0, %c0_0, %c0_1] : memref<1x2x128xf32, #tpu.memory_space<vmem>>, vector<1x2x128xf32>
    %3 = vector.broadcast %1 : f32 to vector<1x2x128xf32>
    %4 = arith.addf %2, %3 : vector<1x2x128xf32>
    %c0_i32 = arith.constant 0 : i32
    %c1_i32 = arith.constant 1 : i32
    %5 = arith.sitofp %c0_i32 : i32 to f32
    %6 = vector.broadcast %5 : f32 to vector<1x2x128xf32>
    %7 = arith.maximumf %6, %4 : vector<1x2x128xf32>
    %8 = arith.sitofp %c1_i32 : i32 to f32
    %9 = vector.broadcast %8 : f32 to vector<1x2x128xf32>
    %10 = arith.minimumf %9, %7 : vector<1x2x128xf32>
    %c0_2 = arith.constant 0 : index
    %c0_3 = arith.constant 0 : index
    %c0_4 = arith.constant 0 : index
    %11 = vector.load %arg4[%c0_2, %c0_3, %c0_4] : memref<1x2x128xf32, #tpu.memory_space<vmem>>, vector<1x2x128xf32>
    tpu.vector_store %arg4[%c0_2, %c0_3, %c0_4], %10 {strides = array<i32>} : memref<1x2x128xf32, #tpu.memory_space<vmem>>, vector<1x2x128xf32>,
    return
  }
  func.func @transform_0(%arg0: i32, %arg1: i32) -> i32 {
    %c0_i32 = arith.constant 0 : i32
    %c0_i32_0 = arith.constant 0 : i32
    return %c0_i32 : i32
  }
  func.func @transform_1(%arg0: i32, %arg1: i32) -> (i32, i32, i32) {
    %c0_i32 = arith.constant 0 : i32
    %c0_i32_0 = arith.constant 0 : i32
    return %arg0, %arg1, %c0_i32 : i32, i32, i32
  }
  func.func @transform_2(%arg0: i32, %arg1: i32) -> (i32, i32, i32) {
    %c0_i32 = arith.constant 0 : i32
    %c0_i32_0 = arith.constant 0 : i32
    return %arg0, %arg1, %c0_i32 : i32, i32, i32
  }
}

</mosaic_0001>

<bundles_post_ra>
// kernel: random_channel_shift.1
= control target key start
LH: loop header
LB: loop body
LE: loop exit
PB: predicated region body
PF: predicated region fallthrough
CT: control target
= control target key end

     0   :  { %7 = vsyncpa [#allocation3], 0  ;;  %s383_s9 = smov 0   ;;  %s385_s10 = smov 0   ;;  %s417_s0 = inlined_call_operand.vmem [shape: f32[4], index: 0, kind: input, shape index: {}]   ;;  %s418_s1 = inlined_call_operand.vmem [shape: f32[4,2,128], index: 1, kind: input, shape index: {}, may-alias: {1,2}]   ;;  %s419_s2 = inlined_call_operand.vmem [shape: f32[4,2,128], index: 2, kind: output, shape index: {}, may-alias: {1,2}]  }
   0x1   :  { %s387_s11 = smov 0  }
   0x2 LB: > { %s278_s12 = sadd.s32 4294967295, %s365_s11   ;;  %s25_s13 = sadd.s32 1, %s361_s10  ;;  %s365_s11 = sphi %s387_s11, %s13_s11   ;;  %s361_s10 = sphi %s385_s10, %s421_s10   ;;  %s357_s9 = sphi %s383_s9, %s420_s9  }
   0x3   : > { %p27_p0 = scmp.ge.s32.totalorder %s25_s13, 4  ;;  %p280_p1 = scmp.ge.s32.totalorder %s365_s11, 1 }
   0x4   : > { %p107_p2 = scmp.lt.s32.totalorder %s365_s11, 5  ;;  %p297_p4 = scmp.eq.s32.totalorder %s278_s12, 0 }
   0x5   : > { %s423_s13 = smov (%p27_p0, %s25_s13), 0  ;;  %s119_s16 = sshll.u32 %s417_s0, 4  ;;  %s120_s16 = int_to_ptr.vmem [resolvable:$true] %s119_s16 }
   0x6   : > { %p108_p3 = pnand %p280_p1, %p107_p2  ;;  %s367_s17 = smov [#allocation2]  }
   0x8   : > { %p293_p5 = pneg %p108_p3  ;;  %142 = sbr.rel (%p108_p3) target bundleno = 30 (0x1e), region = 28 }
   0xa   : > { %p294_p6 = pnand %p297_p4, %p293_p5 }
   0xc   : > { %296 = dma.vmem_to_smem (!%p294_p6), %s120_s16, 16, %s367_s17, [#allocation3]  }
   0xd   : > { %352 = dma.done.wait (%p297_p4), [#allocation3], 16  }
   0xe   : > { %354 = vsyncadd (%p297_p4), [#allocation3], 4294967280 }
   0xf   : > { %149 = sfence }
  0x10   : > { %p170_p7 = scmp.lt.s32.totalorder %s357_s9, 3  ;;  %s184_s18 = sld [smem:[#allocation2 + %s357_s9]] }
  0x12   : > { %s425_s9 = smov (!%p170_p7, %s357_s9), 3 }
  0x13   : > { %s285_s19 = sshll.u32 %s425_s9, 1 }
  0x14   : > { %s176_s22 = scalar_lea.vmem %s418_s1, %s285_s19  ;;  %s183_s25 = scalar_lea.vmem %s419_s2, %s285_s19 }
  0x15   : > { %v185_v0 = vld [vmem:[%s176_s22] sm:$0x3] }
  0x16   : > { %v186_v1 = vstv %s184_s18 }
  0x17   : > { %v187_v2 = vadd.f32 %v186_v1, %v185_v0 }
  0x19   : > { %v188_v3 = vmax.f32 %v187_v2, 0.0 }
  0x1b   : > { %v189_v4 = vmin.f32 %v188_v3, 1.0 }
  0x1d   : > { %190 = vst [vmem:[%s183_s25] sm:$0x3] %v189_v4 }
  0x1e PF: > { %s13_s11 = sadd.s32 1, %s365_s11   ;;  %s420_s9 = smov %s361_s10 }
  0x1f   : > { %p10_p8 = scmp.ge.s32.totalorder %s13_s11, 6   ;;  %s421_s10 = smov %s423_s13 }
  0x21   :  { %12 = sbr.rel (!%p10_p8) target bundleno = 2 (0x2), region = 63 }
  0x26   :  { %216 = vsyncpa [#allocation3], 1 }
  0x27   :  { %218 = vsyncpa [#allocation3 + $0x1], 1 }

</bundles_post_ra>
